<compile_context>
chip_gen: v6e
topology: v6e:2x2x1
jax: 0.10.0
libtpu: 0.0.40
codegen_flags: <defaults>
</compile_context>

<pallas_src>
import jax
import jax.numpy as jnp
from jax.experimental import pallas as pl
from jax.experimental.pallas import tpu as pltpu

D_IN, HIDDEN, D_OUT = 784, 256, 10
N_PAD = 128               # lane-dense output; real logits live in columns [:10]
SINGLE_STEP_MAX_BM = 1024  # one grid step up to this many rows (VMEM-safe on v5e/v6e/v7x)
MULTI_STEP_BM = 512        # tile size once we do split the batch


def ffn_kernel(x_ref, w1_ref, b1_ref, w2_ref, b2_ref, o_ref):
    # fc1: cast x to bf16 only at the MXU input (f32 stays the HBM format for x),
    # bf16 x bf16 on the MXU with f32 accumulation.
    h = jnp.dot(x_ref[...].astype(jnp.bfloat16), w1_ref[...],
                preferred_element_type=jnp.float32)
    # Bias + ReLU in f32 on the VPU (v5e has no bf16 VPU path).
    h = jnp.maximum(h + b1_ref[...], 0.0)
    # Dropout(p=0.2) is identity at inference time.
    # TODO(synk): training-mode dropout would need pltpu.prng_seed / prng_random_bits masking.
    # fc2: keep h in f32 (avoids a second bf16 rounding on the activation path);
    # w2 is bf16-resident and upcast once in VMEM.
    y = jnp.dot(h, w2_ref[...].astype(jnp.float32),
                preferred_element_type=jnp.float32)
    o_ref[...] = (y + b2_ref[...]).astype(o_ref.dtype)


def prepare_ffn_params(w1, b1, w2, b2):
    """One-time prep (outside the hot loop): bf16 weights, pad fc2's N from 10 to 128."""
    w1p = w1.astype(jnp.bfloat16)                                              # (784, 256)
    w2p = jnp.pad(w2.astype(jnp.float32),
                  ((0, 0), (0, N_PAD - D_OUT))).astype(jnp.bfloat16)           # (256, 128)
    b1p = b1.astype(jnp.float32).reshape(1, HIDDEN)                            # (1, 256)
    b2p = jnp.pad(b2.astype(jnp.float32), (0, N_PAD - D_OUT)).reshape(1, N_PAD)  # (1, 128)
    return w1p, b1p, w2p, b2p


def _round_up(x, m):
    return ((x + m - 1) // m) * m


def _has_two_tensorcores():
    # v7x has 2 TensorCores/chip; v5e/v6e have 1.  Conservative default: single-TC.
    try:
        kind = jax.devices()[0].device_kind.lower()
    except Exception:
        return False
    return "v7" in kind or "7x" in kind


def _pick_bm(batch, two_cores):
    if two_cores and batch >= 256:
        # >= 2 well-sized "parallel" grid steps so both TensorCores get work;
        # bm % 16 == 0 keeps bf16 sublane packing dense.
        return min(MULTI_STEP_BM, _round_up(pl.cdiv(batch, 2), 16))
    if batch <= SINGLE_STEP_MAX_BM:
        # Single-TC chips / small batches: one grid step, no batch padding,
        # no per-step pipeline overhead.
        return batch
    return MULTI_STEP_BM


def ff_net_forward(x, params, *, bm=None):
    w1p, b1p, w2p, b2p = params
    B = x.shape[0]
    if bm is None:
        bm = _pick_bm(B, _has_two_tensorcores())
    b_pad = pl.cdiv(B, bm) * bm
    # Batch pad only in the (large-batch) multi-step case; the common path is a no-op.
    xp = x if b_pad == B else jnp.pad(x, ((0, b_pad - B), (0, 0)))

    # Grid-resident operands: constant block index, single buffer (fetched once,
    # no redundant second VMEM buffer).
    def resident(shape):
        return pl.BlockSpec(shape, lambda i: (0, 0), pipeline_mode=pl.Buffered(1))

    flops = 2 * b_pad * D_IN * HIDDEN + 2 * b_pad * HIDDEN * N_PAD
    bytes_accessed = (xp.size * xp.dtype.itemsize
                      + w1p.size * 2 + w2p.size * 2
                      + b1p.size * 4 + b2p.size * 4
                      + b_pad * N_PAD * 2)

    out = pl.pallas_call(
        ffn_kernel,
        out_shape=jax.ShapeDtypeStruct((b_pad, N_PAD), jnp.bfloat16),
        grid_spec=pltpu.PrefetchScalarGridSpec(
            num_scalar_prefetch=0,
            grid=(b_pad // bm,),
            in_specs=[
                pl.BlockSpec((bm, D_IN), lambda i: (i, 0)),   # x tile (pipelined, f32, K unpadded)
                resident((D_IN, HIDDEN)),                     # w1 (bf16)
                resident((1, HIDDEN)),                        # b1 (f32)
                resident((HIDDEN, N_PAD)),                    # w2 (bf16)
                resident((1, N_PAD)),                         # b2 (f32)
            ],
            out_specs=pl.BlockSpec((bm, N_PAD), lambda i: (i, 0)),
        ),
        compiler_params=pltpu.CompilerParams(
            dimension_semantics=("parallel",),
        ),
        cost_estimate=pl.CostEstimate(
            flops=flops, transcendentals=0, bytes_accessed=bytes_accessed),
    )(xp, w1p, b1p, w2p, b2p)

    return out[:B, :D_OUT].astype(jnp.float32)


def ff_net_reference(x, w1, b1, w2, b2):
    h = jnp.maximum(jnp.dot(x, w1, precision=jax.lax.Precision.HIGHEST) + b1, 0.0)
    return jnp.dot(h, w2, precision=jax.lax.Precision.HIGHEST) + b2


if __name__ == "__main__":
    key = jax.random.PRNGKey(0)
    k_x, k_w1, k_b1, k_w2, k_b2 = jax.random.split(key, 5)

    B = 64

    # Deterministic init mimicking PyTorch Linear's U(-1/sqrt(fan_in), 1/sqrt(fan_in)).
    lim1 = 1.0 / jnp.sqrt(jnp.float32(D_IN))
    lim2 = 1.0 / jnp.sqrt(jnp.float32(HIDDEN))
    w1 = jax.random.uniform(k_w1, (D_IN, HIDDEN), jnp.float32, -lim1, lim1)
    b1 = jax.random.uniform(k_b1, (HIDDEN,), jnp.float32, -lim1, lim1)
    w2 = jax.random.uniform(k_w2, (HIDDEN, D_OUT), jnp.float32, -lim2, lim2)
    b2 = jax.random.uniform(k_b2, (D_OUT,), jnp.float32, -lim2, lim2)
    x = jax.random.normal(k_x, (B, D_IN), jnp.float32)

    params = prepare_ffn_params(w1, b1, w2, b2)
    out = ff_net_forward(x, params)
    out = jax.block_until_ready(out)

    ref = ff_net_reference(x, w1, b1, w2, b2)
    assert out.shape == (B, D_OUT)
    # bf16 matmul inputs + bf16 output store vs. pure-f32 reference -> loose tolerance.
    max_err = jnp.max(jnp.abs(out - ref))
    assert jnp.allclose(out, ref, atol=5e-2, rtol=5e-2), \
        f"mismatch vs reference, max abs err {max_err}"

    print("KERNEL_OK")
</pallas_src>

<mosaic_0001>
module attributes {stable_mosaic.version = 11 : i64} {
  func.func @ffn_kernel(%arg0: i32, %arg1: memref<64x784xf32, #tpu.memory_space<vmem>>, %arg2: memref<784x256xbf16, #tpu.memory_space<vmem>>, %arg3: memref<1x256xf32, #tpu.memory_space<vmem>>, %arg4: memref<256x128xbf16, #tpu.memory_space<vmem>>, %arg5: memref<1x128xf32, #tpu.memory_space<vmem>>, %arg6: memref<64x128xbf16, #tpu.memory_space<vmem>>) attributes {dimension_semantics = [#tpu.dimension_semantics<parallel>], iteration_bounds = array<i64: 1>, scalar_prefetch = 0 : i64, scratch_operands = 0 : i64, tpu.core_type = #tpu.core_type<tc>, window_params = [{transform_indices = @transform_0, window_bounds = array<i64: 64, 784>}, {pipeline_mode = #tpu.pipeline_mode<synchronous>, transform_indices = @transform_1, window_bounds = array<i64: 784, 256>}, {pipeline_mode = #tpu.pipeline_mode<synchronous>, transform_indices = @transform_2, window_bounds = array<i64: 1, 256>}, {pipeline_mode = #tpu.pipeline_mode<synchronous>, transform_indices = @transform_3, window_bounds = array<i64: 256, 128>}, {pipeline_mode = #tpu.pipeline_mode<synchronous>, transform_indices = @transform_4, window_bounds = array<i64: 1, 128>}, {transform_indices = @transform_5, window_bounds = array<i64: 64, 128>}]} {
    %c0 = arith.constant 0 : index
    %c0_0 = arith.constant 0 : index
    %0 = vector.load %arg1[%c0, %c0_0] : memref<64x784xf32, #tpu.memory_space<vmem>>, vector<64x784xf32>
    %1 = arith.truncf %0 : vector<64x784xf32> to vector<64x784xbf16>
    %c0_1 = arith.constant 0 : index
    %c0_2 = arith.constant 0 : index
    %2 = vector.load %arg2[%c0_1, %c0_2] : memref<784x256xbf16, #tpu.memory_space<vmem>>, vector<784x256xbf16>
    %cst = arith.constant dense<0.000000e+00> : vector<64x256xf32>
    %3 = tpu.matmul %1, %2, %cst {dimension_numbers = #tpu.dot_dimension_numbers<[1], [0], [0], [1], [0, 0, 1, 1], [], []>} : vector<64x784xbf16>, vector<784x256xbf16>, vector<64x256xf32> -> vector<64x256xf32>
    %c0_3 = arith.constant 0 : index
    %c0_4 = arith.constant 0 : index
    %4 = vector.load %arg3[%c0_3, %c0_4] : memref<1x256xf32, #tpu.memory_space<vmem>>, vector<1x256xf32>
    %5 = vector.broadcast %4 : vector<1x256xf32> to vector<64x256xf32>
    %6 = arith.addf %3, %5 : vector<64x256xf32>
    %cst_5 = arith.constant 0.000000e+00 : f32
    %7 = vector.broadcast %cst_5 : f32 to vector<64x256xf32>
    %8 = arith.maximumf %6, %7 : vector<64x256xf32>
    %c0_6 = arith.constant 0 : index
    %c0_7 = arith.constant 0 : index
    %9 = vector.load %arg4[%c0_6, %c0_7] : memref<256x128xbf16, #tpu.memory_space<vmem>>, vector<256x128xbf16>
    %10 = arith.extf %9 : vector<256x128xbf16> to vector<256x128xf32>
    %cst_8 = arith.constant dense<0.000000e+00> : vector<64x128xf32>
    %11 = tpu.matmul %8, %10, %cst_8 {dimension_numbers = #tpu.dot_dimension_numbers<[1], [0], [0], [1], [0, 0, 1, 1], [], []>} : vector<64x256xf32>, vector<256x128xf32>, vector<64x128xf32> -> vector<64x128xf32>
    %c0_9 = arith.constant 0 : index
    %c0_10 = arith.constant 0 : index
    %12 = vector.load %arg5[%c0_9, %c0_10] : memref<1x128xf32, #tpu.memory_space<vmem>>, vector<1x128xf32>
    %13 = vector.broadcast %12 : vector<1x128xf32> to vector<64x128xf32>
    %14 = arith.addf %11, %13 : vector<64x128xf32>
    %15 = arith.truncf %14 : vector<64x128xf32> to vector<64x128xbf16>
    %c0_11 = arith.constant 0 : index
    %c0_12 = arith.constant 0 : index
    %16 = vector.load %arg6[%c0_11, %c0_12] : memref<64x128xbf16, #tpu.memory_space<vmem>>, vector<64x128xbf16>
    tpu.vector_store %arg6[%c0_11, %c0_12], %15 {strides = array<i32>} : memref<64x128xbf16, #tpu.memory_space<vmem>>, vector<64x128xbf16>,
    return
  }
  func.func @transform_0(%arg0: i32) -> (i32, i32) {
    %c0_i32 = arith.constant 0 : i32
    %c0_i32_0 = arith.constant 0 : i32
    return %arg0, %c0_i32 : i32, i32
  }
  func.func @transform_1(%arg0: i32) -> (i32, i32) {
    %c0_i32 = arith.constant 0 : i32
    %c0_i32_0 = arith.constant 0 : i32
    %c0_i32_1 = arith.constant 0 : i32
    return %c0_i32, %c0_i32_0 : i32, i32
  }
  func.func @transform_2(%arg0: i32) -> (i32, i32) {
    %c0_i32 = arith.constant 0 : i32
    %c0_i32_0 = arith.constant 0 : i32
    %c0_i32_1 = arith.constant 0 : i32
    return %c0_i32, %c0_i32_0 : i32, i32
  }
  func.func @transform_3(%arg0: i32) -> (i32, i32) {
    %c0_i32 = arith.constant 0 : i32
    %c0_i32_0 = arith.constant 0 : i32
    %c0_i32_1 = arith.constant 0 : i32
    return %c0_i32, %c0_i32_0 : i32, i32
  }
  func.func @transform_4(%arg0: i32) -> (i32, i32) {
    %c0_i32 = arith.constant 0 : i32
    %c0_i32_0 = arith.constant 0 : i32
    %c0_i32_1 = arith.constant 0 : i32
    return %c0_i32, %c0_i32_0 : i32, i32
  }
  func.func @transform_5(%arg0: i32) -> (i32, i32) {
    %c0_i32 = arith.constant 0 : i32
    %c0_i32_0 = arith.constant 0 : i32
    return %arg0, %c0_i32 : i32, i32
  }
}

</mosaic_0001>

<bundles_post_ra>
// kernel: tpu_custom_call.1
= control target key start
LH: loop header
LB: loop body
LE: loop exit
PB: predicated region body
PF: predicated region fallthrough
CT: control target
= control target key end

     0   :  { %10 = vsyncpa [#allocation3], 0  ;;  %s1966_s0 = inlined_call_operand.hbm [shape: f32[64,784], index: 0, kind: input, shape index: {}]   ;;  %s1967_s1 = inlined_call_operand.hbm [shape: bf16[784,256], index: 1, kind: input, shape index: {}]   ;;  %s1968_s2 = inlined_call_operand.vmem [shape: f32[1,256], index: 2, kind: input, shape index: {}]   ;;  %s1969_s3 = inlined_call_operand.hbm [shape: bf16[256,128], index: 3, kind: input, shape index: {}]   ;;  %s1970_s4 = inlined_call_operand.vmem [shape: f32[1,128], index: 4, kind: input, shape index: {}]   ;;  %s1971_s5 = inlined_call_operand.hbm [shape: bf16[64,128], index: 5, kind: output, shape index: {}]  }
   0x1   :  { %11 = vsyncpa [#allocation6], 0 }
   0x2   :  { %12 = vsyncpa [#allocation4], 0  ;;  %s1823_s18 = smov [#allocation5]  }
   0x3   :  { %s30_s19 = sshll.u32 %s1823_s18, 4  ;;  %s31_s19 = int_to_ptr.vmem [resolvable:$true] %s30_s19 }
   0x4   :  { %s1745_s20 = scalar_lea.vmem %s31_s19, 12544  ;;  %p1750_p1 = scmp.lt.s32.totalorder %s31_s19, %s31_s19 }
   0x5   :  { %p1746_p0 = scmp.ne.s32.totalorder %s31_s19, %s1745_s20  ;;  %p1751_p2 = scmp.lt.s32.totalorder %s1745_s20, %s1745_s20 }
   0x7   :  { %p1752_p3 = por %p1751_p2, %p1750_p1 }
   0x9   :  { %p1753_p4 = pnand %p1752_p3, %p1746_p0 }
   0xb   :  { %1756 = shalt.err (!%p1753_p4)
}
   0xc   :  { %s1824_s21 = smov 128   ;;  %s1825_s22 = smov 8  }
   0xd   :  { %36 = dma.hbm_to_vmem [thread:$0]  %s1967_s1, 12544, %s31_s19, [#allocation6], %s1824_s21, %s1824_s21, %s1825_s22  }
   0xe   :  { %s1826_s25 = smov [#allocation2]  }
   0xf   :  { %s18_s26 = sshll.u32 %s1826_s25, 4  ;;  %s19_s26 = int_to_ptr.vmem [resolvable:$true] %s18_s26 }
  0x10   :  { %s1765_s27 = scalar_lea.vmem %s19_s26, 7168  ;;  %p1770_p6 = scmp.lt.s32.totalorder %s19_s26, %s19_s26 }
  0x11   :  { %p1766_p5 = scmp.ne.s32.totalorder %s19_s26, %s1765_s27  ;;  %p1771_p7 = scmp.lt.s32.totalorder %s1765_s27, %s1765_s27 }
  0x13   :  { %p1772_p8 = por %p1771_p7, %p1770_p6 }
  0x15   :  { %p1773_p9 = pnand %p1772_p8, %p1766_p5 }
  0x17   :  { %1776 = shalt.err (!%p1773_p9)
}
  0x18   :  { %s1827_s28 = smov 896   ;;  %s1828_s29 = smov 56  }
  0x19   :  { %24 = dma.hbm_to_vmem [thread:$0]  %s1966_s0, 7168, %s19_s26, [#allocation3], %s1827_s28, %s1827_s28, %s1828_s29  }
  0x1a   :  { %s1829_s7 = smov [#allocation7]  }
  0x1b   :  { %s44_s8 = sshll.u32 %s1829_s7, 4  ;;  %s45_s8 = int_to_ptr.vmem [resolvable:$true] %s44_s8 }
  0x1c   :  { %s1785_s1 = scalar_lea.vmem %s45_s8, 2048  ;;  %p1790_p11 = scmp.lt.s32.totalorder %s45_s8, %s45_s8 }
  0x1d   :  { %p1786_p10 = scmp.ne.s32.totalorder %s45_s8, %s1785_s1  ;;  %p1791_p12 = scmp.lt.s32.totalorder %s1785_s1, %s1785_s1 }
  0x1f   :  { %p1792_p13 = por %p1791_p12, %p1790_p11 }
  0x21   :  { %p1793_p0 = pnand %p1792_p13, %p1786_p10 }
  0x23   :  { %1796 = shalt.err (!%p1793_p0)
}
  0x24   :  { %s1830_s9 = smov 64   ;;  %s1831_s10 = smov 4  }
  0x25   :  { %50 = dma.hbm_to_vmem [thread:$0]  %s1969_s3, 2048, %s45_s8, [#allocation6], %s1830_s9, %s1830_s9, %s1831_s10  }
  0x26   :  { %1817 = dma.done.wait [#allocation3], 7168  }
  0x27   :  { %1818 = vsyncadd [#allocation3], 4294960128 }
  0x28   :  { %1819 = dma.done.wait [#allocation6], 14592  }
  0x29   :  { %1820 = vsyncadd [#allocation6], 4294952704  ;;  %v1590_v0 = vld [vmem:[#allocation5 + $0x74] ss:$8 sps:$4 sm:$0xff]   ;;  %v1592_v1 = vld [vmem:[#allocation5 + $0x70] ss:$8 sps:$4 sm:$0xff]  }
  0x2a   :  { %760 = vmatprep.subr.bf16.mxu0 %v1590_v0  ;;  %v1593_v2 = vld [vmem:[#allocation5 + $0x174] ss:$8 sps:$4 sm:$0xff]   ;;  %v1595_v3 = vld [vmem:[#allocation5 + $0x170] ss:$8 sps:$4 sm:$0xff]   ;;  %v1596_v4 = vld [vmem:[#allocation5 + $0x64] ss:$8 sps:$4 sm:$0xff]  }
  0x2b   :  { %761 = vmatpush1.bf16.msra.mxu0 %v1592_v1  ;;  %v1598_v5 = vld [vmem:[#allocation5 + $0x60] ss:$8 sps:$4 sm:$0xff]   ;;  %833 = vmatprep.subr.bf16.mxu1 %v1593_v2  ;;  %v1599_v6 = vld [vmem:[#allocation5 + $0x164] ss:$8 sps:$4 sm:$0xff]   ;;  %v1602_v8 = vld [vmem:[#allocation5 + $0x54] ss:$8 sps:$4 sm:$0xff]  }
  0x2c   :  { %834 = vmatpush1.bf16.msra.mxu1 %v1595_v3  ;;  %762 = vmatprep.subr.bf16.mxu0 %v1596_v4  ;;  %v1601_v7 = vld [vmem:[#allocation5 + $0x160] ss:$8 sps:$4 sm:$0xff]   ;;  %v1604_v9 = vld [vmem:[#allocation5 + $0x50] ss:$8 sps:$4 sm:$0xff]   ;;  %v1605_v10 = vld [vmem:[#allocation5 + $0x154] ss:$8 sps:$4 sm:$0xff]  }
  0x2d   :  { %835 = vmatprep.subr.bf16.mxu1 %v1599_v6  ;;  %v1608_v11 = vld [vmem:[#allocation5 + $0x44] ss:$8 sps:$4 sm:$0xff]   ;;  %v1607_v12 = vld [vmem:[#allocation5 + $0x150] ss:$8 sps:$4 sm:$0xff]   ;;  %v1610_v14 = vld [vmem:[#allocation5 + $0x40] ss:$8 sps:$4 sm:$0xff]  }
  0x2e   :  { %v1611_v13 = vld [vmem:[#allocation5 + $0x144] ss:$8 sps:$4 sm:$0xff]   ;;  %v1614_v15 = vld [vmem:[#allocation5 + $0x34] ss:$8 sps:$4 sm:$0xff]   ;;  %v1613_v16 = vld [vmem:[#allocation5 + $0x140] ss:$8 sps:$4 sm:$0xff]  }
  0x2f   :  { %763 = vmatpush1.bf16.msra.mxu0 %v1598_v5  ;;  %v1617_v17 = vld [vmem:[#allocation5 + $0x134] ss:$8 sps:$4 sm:$0xff]   ;;  %v1616_v18 = vld [vmem:[#allocation5 + $0x30] ss:$8 sps:$4 sm:$0xff]   ;;  %v1620_v19 = vld [vmem:[#allocation5 + $0x24] ss:$8 sps:$4 sm:$0xff]  }
  0x30   :  { %764 = vmatprep.subr.bf16.mxu0 %v1602_v8  ;;  %836 = vmatpush1.bf16.msra.mxu1 %v1601_v7  ;;  %v1619_v20 = vld [vmem:[#allocation5 + $0x130] ss:$8 sps:$4 sm:$0xff]   ;;  %v1623_v21 = vld [vmem:[#allocation5 + $0x124] ss:$8 sps:$4 sm:$0xff]   ;;  %v1622_v22 = vld [vmem:[#allocation5 + $0x20] ss:$8 sps:$4 sm:$0xff]  }
  0x31   :  { %837 = vmatprep.subr.bf16.mxu1 %v1605_v10  ;;  %v1626_v23 = vld [vmem:[#allocation5 + $0x14] ss:$8 sps:$4 sm:$0xff]   ;;  %v1625_v24 = vld [vmem:[#allocation5 + $0x120] ss:$8 sps:$4 sm:$0xff]   ;;  %v1628_v26 = vld [vmem:[#allocation5 + $0x10] ss:$8 sps:$4 sm:$0xff]  }
  0x32   :  { %v1629_v25 = vld [vmem:[#allocation5 + $0x114] ss:$8 sps:$4 sm:$0xff]   ;;  %v1632_v27 = vld [vmem:[#allocation5 + $0x4] ss:$8 sps:$4 sm:$0xff]   ;;  %v1631_v28 = vld [vmem:[#allocation5 + $0x110] ss:$8 sps:$4 sm:$0xff]  }
  0x33   :  { %765 = vmatpush1.bf16.msra.mxu0 %v1604_v9  ;;  %v1635_v29 = vld [vmem:[#allocation5 + $0x104] ss:$8 sps:$4 sm:$0xff]   ;;  %v1634_v30 = vld [vmem:[#allocation5] ss:$8 sps:$4 sm:$0xff]   ;;  %v1638_v31 = vld [vmem:[#allocation5 + $0xf4] ss:$8 sps:$4 sm:$0xff]  }
  0x34   :  { %766 = vmatprep.subr.bf16.mxu0 %v1608_v11  ;;  %838 = vmatpush1.bf16.msra.mxu1 %v1607_v12  ;;  %v1637_v32 = vld [vmem:[#allocation5 + $0x100] ss:$8 sps:$4 sm:$0xff]   ;;  %v1641_v33 = vld [vmem:[#allocation5 + $0x1f4] ss:$8 sps:$4 sm:$0xff]   ;;  %v1640_v34 = vld [vmem:[#allocation5 + $0xf0] ss:$8 sps:$4 sm:$0xff]  }
  0x35   :  { %839 = vmatprep.subr.bf16.mxu1 %v1611_v13  ;;  %v1644_v35 = vld [vmem:[#allocation5 + $0xe4] ss:$8 sps:$4 sm:$0xff]   ;;  %v1643_v36 = vld [vmem:[#allocation5 + $0x1f0] ss:$8 sps:$4 sm:$0xff]   ;;  %v1646_v38 = vld [vmem:[#allocation5 + $0xe0] ss:$8 sps:$4 sm:$0xff]  }
  0x36   :  { %v1647_v37 = vld [vmem:[#allocation5 + $0x1e4] ss:$8 sps:$4 sm:$0xff]   ;;  %v1650_v39 = vld [vmem:[#allocation5 + $0xd4] ss:$8 sps:$4 sm:$0xff]   ;;  %v1649_v40 = vld [vmem:[#allocation5 + $0x1e0] ss:$8 sps:$4 sm:$0xff]  }
  0x37   :  { %767 = vmatpush1.bf16.msra.mxu0 %v1610_v14  ;;  %v1653_v41 = vld [vmem:[#allocation5 + $0x1d4] ss:$8 sps:$4 sm:$0xff]   ;;  %v1652_v42 = vld [vmem:[#allocation5 + $0xd0] ss:$8 sps:$4 sm:$0xff]   ;;  %v1656_v43 = vld [vmem:[#allocation5 + $0xc4] ss:$8 sps:$4 sm:$0xff]  }
  0x38   :  { %768 = vmatprep.subr.bf16.mxu0 %v1614_v15  ;;  %840 = vmatpush1.bf16.msra.mxu1 %v1613_v16  ;;  %v1655_v44 = vld [vmem:[#allocation5 + $0x1d0] ss:$8 sps:$4 sm:$0xff]   ;;  %v1659_v45 = vld [vmem:[#allocation5 + $0x1c4] ss:$8 sps:$4 sm:$0xff]   ;;  %v1658_v48 = vld [vmem:[#allocation5 + $0xc0] ss:$8 sps:$4 sm:$0xff]  }
  0x39   :  { %841 = vmatprep.subr.bf16.mxu1 %v1617_v17  ;;  %v64_v46 = vld [vmem:[#allocation2 + $0x8] sm:$0xff]  ;;  %v71_v47 = vld [vmem:[#allocation2 + $0x40] sm:$0xff]  ;;  %v1662_v50 = vld [vmem:[#allocation5 + $0xb4] ss:$8 sps:$4 sm:$0xff]   ;;  %vm747_vm0 = vcmask 130048  }
  0x3a   :  { %v120_v49 = vpack.c.bf16 %v71_v47, %v64_v46  ;;  %v1661_v51 = vld [vmem:[#allocation5 + $0x1c0] ss:$8 sps:$4 sm:$0xff]   ;;  %v66_v52 = vld [vmem:[#allocation2 + $0x18] sm:$0xff]  ;;  %v73_v53 = vld [vmem:[#allocation2 + $0x50] sm:$0xff] }
  0x3b   :  { %769 = vmatpush1.bf16.msra.mxu0 %v1616_v18  ;;  %v1665_v54 = vld [vmem:[#allocation5 + $0x1b4] ss:$8 sps:$4 sm:$0xff]   ;;  %v122_v55 = vpack.c.bf16 %v73_v53, %v66_v52  ;;  %v1664_v56 = vld [vmem:[#allocation5 + $0xb0] ss:$8 sps:$4 sm:$0xff]   ;;  %v1668_v57 = vld [vmem:[#allocation5 + $0xa4] ss:$8 sps:$4 sm:$0xff]  }
  0x3c   :  { %770 = vmatprep.subr.bf16.mxu0 %v1620_v19  ;;  %842 = vmatpush1.bf16.msra.mxu1 %v1619_v20  ;;  %v1667_v58 = vld [vmem:[#allocation5 + $0x1b0] ss:$8 sps:$4 sm:$0xff]   ;;  %v1671_v59 = vld [vmem:[#allocation5 + $0x1a4] ss:$8 sps:$4 sm:$0xff]   ;;  %v1670_v60 = vld [vmem:[#allocation5 + $0xa0] ss:$8 sps:$4 sm:$0xff]  }
  0x3d   :  { %843 = vmatprep.subr.bf16.mxu1 %v1623_v21  ;;  %792 = vmatprep.mubr.bf16.mxu0 %v120_v49  ;;  %v1674_v61 = vld [vmem:[#allocation5 + $0x94] ss:$8 sps:$4 sm:$0xff]   ;;  %v1673_v62 = vld [vmem:[#allocation5 + $0x1a0] ss:$8 sps:$4 sm:$0xff]   ;;  %v1676_v0 = vld [vmem:[#allocation5 + $0x90] ss:$8 sps:$4 sm:$0xff]  }
  0x3e   :  { %865 = vmatprep.mubr.bf16.mxu1 %v122_v55  ;;  %v1677_v63 = vld [vmem:[#allocation5 + $0x194] ss:$8 sps:$4 sm:$0xff]   ;;  %v1680_v1 = vld [vmem:[#allocation5 + $0x84] ss:$8 sps:$4 sm:$0xff]   ;;  %v1679_v2 = vld [vmem:[#allocation5 + $0x190] ss:$8 sps:$4 sm:$0xff]  }
  0x3f   :  { %771 = vmatpush1.bf16.msra.mxu0 %v1622_v22  ;;  %v1682_v3 = vld [vmem:[#allocation5 + $0x80] ss:$8 sps:$4 sm:$0xff]   ;;  %v1683_v4 = vld [vmem:[#allocation5 + $0x184] ss:$8 sps:$4 sm:$0xff]   ;;  %v70_v7 = vld [vmem:[#allocation2 + $0x38] sm:$0xff] }
  0x40   :  { %772 = vmatprep.subr.bf16.mxu0 %v1626_v23  ;;  %844 = vmatpush1.bf16.msra.mxu1 %v1625_v24  ;;  %v63_v5 = vld [vmem:[#allocation2] sm:$0xff]  ;;  %v1688_v8 = vld [vmem:[#allocation5 + $0x274] ss:$8 sps:$4 sm:$0xff]   ;;  %v72_v10 = vld [vmem:[#allocation2 + $0x48] sm:$0xff] }
  0x41   :  { %845 = vmatprep.subr.bf16.mxu1 %v1629_v25  ;;  %v1685_v6 = vld [vmem:[#allocation5 + $0x180] ss:$8 sps:$4 sm:$0xff]   ;;  %v65_v9 = vld [vmem:[#allocation2 + $0x10] sm:$0xff]  ;;  %v78_v11 = vld [vmem:[#allocation2 + $0x78] sm:$0xff]  ;;  %v119_v14 = vpack.c.bf16 %v70_v7, %v63_v5 }
  0x42   :  { %v85_v12 = vld [vmem:[#allocation2 + $0xb0] sm:$0xff]  ;;  %v1715_v13 = vld [vmem:[#allocation5 + $0x304] ss:$8 sps:$4 sm:$0xff]   ;;  %v121_v19 = vpack.c.bf16 %v72_v10, %v65_v9  ;;  %v1689_v21 = vld [vmem:[#allocation5 + $0x260] ss:$8 sps:$4 sm:$0xff]  }
  0x43   :  { %773 = vmatpush1.bf16.msra.mxu0 %v1628_v26  ;;  %v80_v15 = vld [vmem:[#allocation2 + $0x88] sm:$0xff]  ;;  %v87_v16 = vld [vmem:[#allocation2 + $0xc0] sm:$0xff]  ;;  %v1686_v17 = vld [vmem:[#allocation5 + $0x270] ss:$8 sps:$4 sm:$0xff]   ;;  %v127_v18 = vpack.c.bf16 %v85_v12, %v78_v11 }
  0x44   :  { %774 = vmatprep.subr.bf16.mxu0 %v1632_v27  ;;  %846 = vmatpush1.bf16.msra.mxu1 %v1631_v28  ;;  %v1691_v20 = vld [vmem:[#allocation5 + $0x264] ss:$8 sps:$4 sm:$0xff]   ;;  %v1713_v22 = vld [vmem:[#allocation5 + $0x300] ss:$8 sps:$4 sm:$0xff]   ;;  %v129_v23 = vpack.c.bf16 %v87_v16, %v80_v15  ;;  %v1694_v24 = vld [vmem:[#allocation5 + $0x254] ss:$8 sps:$4 sm:$0xff]  }
  0x45   :  { %847 = vmatprep.subr.bf16.mxu1 %v1635_v29  ;;  %v77_v25 = vld [vmem:[#allocation2 + $0x70] sm:$0xff]  ;;  %v84_v26 = vld [vmem:[#allocation2 + $0xa8] sm:$0xff]  ;;  %v99_v28 = vld [vmem:[#allocation2 + $0x120] sm:$0xff] }
  0x46   :  { %v92_v27 = vld [vmem:[#allocation2 + $0xe8] sm:$0xff]  ;;  %v79_v29 = vld [vmem:[#allocation2 + $0x80] sm:$0xff]  ;;  %v1712_v5 = vld [vmem:[#allocation5 + $0x2f4] ss:$8 sps:$4 sm:$0xff]  }
  0x47   :  { %775 = vmatpush1.bf16.msra.mxu0 %v1634_v30  ;;  %v86_v30 = vld [vmem:[#allocation2 + $0xb8] sm:$0xff]  ;;  %v100_v46 = vld [vmem:[#allocation2 + $0x128] sm:$0xff]  ;;  %v115_v49 = vld [vmem:[#allocation2 + $0x1a0] sm:$0xff] }
  0x48   :  { %776 = vmatprep.subr.bf16.mxu0 %v1638_v31  ;;  %848 = vmatpush1.bf16.msra.mxu1 %v1637_v32  ;;  %v126_v31 = vpack.c.bf16 %v84_v26, %v77_v25  ;;  %v94_v32 = vld [vmem:[#allocation2 + $0xf8] sm:$0xff]  ;;  %v1703_v52 = vld [vmem:[#allocation5 + $0x224] ss:$8 sps:$4 sm:$0xff]   ;;  %v1701_v55 = vld [vmem:[#allocation5 + $0x220] ss:$8 sps:$4 sm:$0xff]  }
  0x49   :  { %849 = vmatprep.subr.bf16.mxu1 %v1641_v33  ;;  %v101_v33 = vld [vmem:[#allocation2 + $0x130] sm:$0xff]  ;;  %v1718_v10 = vld [vmem:[#allocation5 + $0x2e4] ss:$8 sps:$4 sm:$0xff]   ;;  %v1716_v12 = vld [vmem:[#allocation5 + $0x2e0] ss:$8 sps:$4 sm:$0xff]  }
  0x4a   :  { %v69_v7 = vld [vmem:[#allocation2 + $0x30] sm:$0xff]  ;;  %v90_v15 = vld [vmem:[#allocation2 + $0xd8] sm:$0xff]  ;;  %v1728_v26 = vld [vmem:[#allocation5 + $0x2a0] ss:$8 sps:$4 sm:$0xff]  }
  0x4b   :  { %777 = vmatpush2.bf16.msra.mxu0 %v1640_v34  ;;  %v1692_v34 = vld [vmem:[#allocation5 + $0x250] ss:$8 sps:$4 sm:$0xff]  }
  0x4c   :  { %778 = vmatprep.subr.bf16.mxu0 %v1644_v35  ;;  %850 = vmatpush2.bf16.msra.mxu1 %v1643_v36  ;;  %v134_v35 = vpack.c.bf16 %v99_v28, %v92_v27  ;;  %v1697_v36 = vld [vmem:[#allocation5 + $0x244] ss:$8 sps:$4 sm:$0xff]   ;;  %v1710_v9 = vld [vmem:[#allocation5 + $0x2f0] ss:$8 sps:$4 sm:$0xff]   ;;  %v1733_v27 = vld [vmem:[#allocation5 + $0x294] ss:$8 sps:$4 sm:$0xff]  }
  0x4d   :  { %851 = vmatprep.subr.bf16.mxu1 %v1647_v37  ;;  %v128_v37 = vpack.c.bf16 %v86_v30, %v79_v29  ;;  %v1719_v16 = vld [vmem:[#allocation5 + $0x2d0] ss:$8 sps:$4 sm:$0xff]   ;;  %v111_v28 = vld [vmem:[#allocation2 + $0x180] sm:$0xff] }
  0x4e   :  { %v118_v29 = vld [vmem:[#allocation2 + $0x1b8] sm:$0xff] }
  0x4f   :  { %779 = vmatpush2.bf16.msra.mxu0 %v1646_v38  ;;  %v136_v38 = vpack.c.bf16 %v101_v33, %v94_v32  ;;  %v1731_v30 = vld [vmem:[#allocation5 + $0x290] ss:$8 sps:$4 sm:$0xff]   ;;  %v146_v32 = vpack.c.bf16 %v118_v29, %v111_v28  ;;  %v1734_v33 = vld [vmem:[#allocation5 + $0x280] ss:$8 sps:$4 sm:$0xff]  }
  0x50   :  { %780 = vmatprep.subr.bf16.mxu0 %v1650_v39  ;;  %852 = vmatpush2.bf16.msra.mxu1 %v1649_v40  ;;  %v1695_v39 = vld [vmem:[#allocation5 + $0x240] ss:$8 sps:$4 sm:$0xff]   ;;  %v1505_v29 = vld [vmem:[#allocation7 + $0x8] sm:$0xff]  }
  0x51   :  { %853 = vmatprep.subr.bf16.mxu1 %v1653_v41  ;;  %v91_v40 = vld [vmem:[#allocation2 + $0xe0] sm:$0xff]  ;;  %v98_v41 = vld [vmem:[#allocation2 + $0x118] sm:$0xff] }
  0x52   :  { %v133_v47 = vpack.c.bf16 %v98_v41, %v91_v40  ;;  %v81_v40 = vld [vmem:[#allocation2 + $0x90] sm:$0xff]  ;;  %v88_v41 = vld [vmem:[#allocation2 + $0xc8] sm:$0xff] }
  0x53   :  { %781 = vmatpush2.bf16.msra.mxu0 %v1652_v42  ;;  %v1700_v42 = vld [vmem:[#allocation5 + $0x234] ss:$8 sps:$4 sm:$0xff]  }
  0x54   :  { %782 = vmatprep.subr.bf16.mxu0 %v1656_v43  ;;  %854 = vmatpush2.bf16.msra.mxu1 %v1655_v44  ;;  %v106_v43 = vld [vmem:[#allocation2 + $0x158] sm:$0xff]  ;;  %v113_v44 = vld [vmem:[#allocation2 + $0x190] sm:$0xff] }
  0x55   :  { %855 = vmatprep.subr.bf16.mxu1 %v1659_v45  ;;  %v93_v45 = vld [vmem:[#allocation2 + $0xf0] sm:$0xff] }
  0x56   :  { %v135_v53 = vpack.c.bf16 %v100_v46, %v93_v45  ;;  %v95_v46 = vld [vmem:[#allocation2 + $0x100] sm:$0xff] }
  0x57   :  { %783 = vmatpush2.bf16.msra.mxu0 %v1658_v48  ;;  %v108_v48 = vld [vmem:[#allocation2 + $0x168] sm:$0xff] }
  0x58   :  { %784 = vmatprep.subr.bf16.mxu0 %v1662_v50  ;;  %856 = vmatpush2.bf16.msra.mxu1 %v1661_v51  ;;  %v1698_v50 = vld [vmem:[#allocation5 + $0x230] ss:$8 sps:$4 sm:$0xff]   ;;  %v141_v51 = vpack.c.bf16 %v113_v44, %v106_v43  ;;  %v103_v43 = vld [vmem:[#allocation2 + $0x140] sm:$0xff]  ;;  %v130_v44 = vpack.c.bf16 %v88_v41, %v81_v40 }
  0x59   :  { %857 = vmatprep.subr.bf16.mxu1 %v1665_v54  ;;  %v143_v54 = vpack.c.bf16 %v115_v49, %v108_v48  ;;  %v110_v48 = vld [vmem:[#allocation2 + $0x178] sm:$0xff]  ;;  %v117_v49 = vld [vmem:[#allocation2 + $0x1b0] sm:$0xff] }
  0x5b   :  { %785 = vmatpush2.bf16.msra.mxu0 %v1664_v56  ;;  %v105_v56 = vld [vmem:[#allocation2 + $0x150] sm:$0xff] }
  0x5c   :  { %786 = vmatprep.subr.bf16.mxu0 %v1668_v57  ;;  %858 = vmatpush2.bf16.msra.mxu1 %v1667_v58  ;;  %v112_v57 = vld [vmem:[#allocation2 + $0x188] sm:$0xff]  ;;  %v1706_v58 = vld [vmem:[#allocation5 + $0x214] ss:$8 sps:$4 sm:$0xff]  }
  0x5d   :  { %859 = vmatprep.subr.bf16.mxu1 %v1671_v59  ;;  %v68_v59 = vld [vmem:[#allocation2 + $0x28] sm:$0xff] }
  0x5f   :  { %787 = vmatpush2.bf16.msra.mxu0 %v1670_v60  ;;  %v75_v60 = vld [vmem:[#allocation2 + $0x60] sm:$0xff] }
  0x60   :  { %788 = vmatprep.subr.bf16.mxu0 %v1674_v61  ;;  %860 = vmatpush2.bf16.msra.mxu1 %v1673_v62  ;;  %v107_v61 = vld [vmem:[#allocation2 + $0x160] sm:$0xff]  ;;  %v114_v62 = vld [vmem:[#allocation2 + $0x198] sm:$0xff] }
  0x61   :  { %861 = vmatprep.subr.bf16.mxu1 %v1677_v63  ;;  %v140_v63 = vpack.c.bf16 %v112_v57, %v105_v56  ;;  %v1511_v56 = vld [vmem:[#allocation7 + $0x38] sm:$0xff]  }
  0x63   :  { %789 = vmatpush2.bf16.msra.mxu0 %v1676_v0  ;;  %v1704_v0 = vld [vmem:[#allocation5 + $0x210] ss:$8 sps:$4 sm:$0xff]  }
  0x64   :  { %790 = vmatprep.subr.bf16.mxu0 %v1680_v1  ;;  %862 = vmatpush2.bf16.msra.mxu1 %v1679_v2  ;;  %v124_v1 = vpack.c.bf16 %v75_v60, %v68_v59  ;;  %v1709_v2 = vld [vmem:[#allocation5 + $0x204] ss:$8 sps:$4 sm:$0xff]   ;;  %v1451_v59 = vunpack.c.l.bf16 %v1511_v56 }
  0x65   :  { %863 = vmatprep.subr.bf16.mxu1 %v1683_v4  ;;  %v1707_v4 = vld [vmem:[#allocation5 + $0x200] ss:$8 sps:$4 sm:$0xff]  }
  0x66   :  { %v1518_v60 = vld [vmem:[#allocation7 + $0x70] sm:$0xff]  }
  0x67   :  { %791 = vmatpush2.bf16.msra.mxu0 %v1682_v3  ;;  %v142_v3 = vpack.c.bf16 %v114_v62, %v107_v61  ;;  %v1480_v62 = vunpack.c.h.bf16 %v1518_v60 }
  0x68   :  { %906 = vmatprep.subr.bf16.mxu0 %v1688_v8  ;;  %864 = vmatpush2.bf16.msra.mxu1 %v1685_v6  ;;  %v1832_v6 = vmov 0   ;;  %v76_v8 = vld [vmem:[#allocation2 + $0x68] sm:$0xff] }
  0x69   :  { %993 = vmatprep.subr.bf16.mxu1 %v1715_v13  ;;  %v125_v11 = vpack.c.bf16 %v76_v8, %v69_v7  ;;  %v1721_v13 = vld [vmem:[#allocation5 + $0x2d4] ss:$8 sps:$4 sm:$0xff]  }
  0x6a   :  { %793 = vmatmul.mubr.bf16.vlgmr.msra.gmra.mxu0 %v119_v14  ;;  %v83_v14 = vld [vmem:[#allocation2 + $0xa0] sm:$0xff] }
  0x6b   :  { %907 = vmatpush1.bf16.msra.mxu0 %v1686_v17  ;;  %802 = vmatprep.mubr.bf16.mxu0 %v127_v18  ;;  %v1724_v17 = vld [vmem:[#allocation5 + $0x2c4] ss:$8 sps:$4 sm:$0xff]   ;;  %v132_v18 = vpack.c.bf16 %v90_v15, %v83_v14 }
  0x6c   :  { %866 = vmatmul.mubr.bf16.vlgmr.msra.gmra.mxu1 %v121_v19  ;;  %908 = vmatprep.subr.bf16.mxu0 %v1691_v20  ;;  %v1722_v19 = vld [vmem:[#allocation5 + $0x2c0] ss:$8 sps:$4 sm:$0xff]   ;;  %v1727_v20 = vld [vmem:[#allocation5 + $0x2b4] ss:$8 sps:$4 sm:$0xff]  }
  0x6d   :  { %994 = vmatpush1.bf16.msra.mxu1 %v1713_v22  ;;  %875 = vmatprep.mubr.bf16.mxu1 %v129_v23  ;;  %v104_v22 = vld [vmem:[#allocation2 + $0x148] sm:$0xff]  ;;  %v1725_v23 = vld [vmem:[#allocation5 + $0x2b0] ss:$8 sps:$4 sm:$0xff]  }
  0x6e   :  { %v1515_v15 = vld [vmem:[#allocation7 + $0x58] sm:$0xff]  }
  0x6f   :  { %909 = vmatpush1.bf16.msra.mxu0 %v1689_v21  ;;  %v97_v21 = vld [vmem:[#allocation2 + $0x110] sm:$0xff] }
  0x70   :  { %910 = vmatprep.subr.bf16.mxu0 %v1694_v24  ;;  %v1730_v24 = vld [vmem:[#allocation5 + $0x2a4] ss:$8 sps:$4 sm:$0xff]   ;;  %v139_v25 = vpack.c.bf16 %v104_v22, %v97_v21 }
  0x71   :  { %v1514_v21 = vld [vmem:[#allocation7 + $0x50] sm:$0xff]  }
  0x72   :  { %803 = vmatmul.mubr.bf16.gmra.mxu0 %v126_v31  ;;  %v1736_v31 = vld [vmem:[#allocation5 + $0x284] ss:$8 sps:$4 sm:$0xff]   ;;  %v1464_v22 = vunpack.c.h.bf16 %v1514_v21 }
  0x73   :  { %911 = vmatpush1.bf16.msra.mxu0 %v1692_v34  ;;  %812 = vmatprep.mubr.bf16.mxu0 %v134_v35  ;;  %v67_v34 = vld [vmem:[#allocation2 + $0x20] sm:$0xff]  ;;  %v74_v35 = vld [vmem:[#allocation2 + $0x58] sm:$0xff] }
  0x74   :  { %912 = vmatprep.subr.bf16.mxu0 %v1697_v36  ;;  %876 = vmatmul.mubr.bf16.gmra.mxu1 %v128_v37  ;;  %v82_v36 = vld [vmem:[#allocation2 + $0x98] sm:$0xff]  ;;  %v89_v37 = vld [vmem:[#allocation2 + $0xd0] sm:$0xff] }
  0x75   :  { %885 = vmatprep.mubr.bf16.mxu1 %v136_v38  ;;  %v123_v38 = vpack.c.bf16 %v74_v35, %v67_v34  ;;  %v1422_v35 = vld [vmem:[#allocation7] sm:$0xff]  }
  0x77   :  { %913 = vmatpush1.bf16.msra.mxu0 %v1695_v39  ;;  %v131_v39 = vpack.c.bf16 %v89_v37, %v82_v36  ;;  %v1424_v36 = vunpack.c.h.bf16 %v1422_v35 }
  0x78   :  { %914 = vmatprep.subr.bf16.mxu0 %v1700_v42  ;;  %v96_v42 = vld [vmem:[#allocation2 + $0x108] sm:$0xff] }
  0x79   :  { %v138_v45 = vpack.c.bf16 %v103_v43, %v96_v42 }
  0x7a   :  { %813 = vmatmul.mubr.bf16.gmra.mxu0 %v133_v47  ;;  %v102_v47 = vld [vmem:[#allocation2 + $0x138] sm:$0xff] }
  0x7b   :  { %915 = vmatpush1.bf16.msra.mxu0 %v1698_v50  ;;  %822 = vmatprep.mubr.bf16.mxu0 %v141_v51  ;;  %v137_v50 = vpack.c.bf16 %v102_v47, %v95_v46  ;;  %v145_v51 = vpack.c.bf16 %v117_v49, %v110_v48 }
  0x7c   :  { %916 = vmatprep.subr.bf16.mxu0 %v1703_v52  ;;  %886 = vmatmul.mubr.bf16.gmra.mxu1 %v135_v53  ;;  %v1519_v52 = vld [vmem:[#allocation7 + $0x78] sm:$0xff]  }
  0x7d   :  { %895 = vmatprep.mubr.bf16.mxu1 %v143_v54  ;;  %v1484_v53 = vunpack.c.h.bf16 %v1519_v52  ;;  %v109_v54 = vld [vmem:[#allocation2 + $0x170] sm:$0xff]  ;;  %v1483_v57 = vunpack.c.l.bf16 %v1519_v52 }
  0x7f   :  { %917 = vmatpush1.bf16.msra.mxu0 %v1701_v55  ;;  %v116_v55 = vld [vmem:[#allocation2 + $0x1a8] sm:$0xff]  ;;  %1523 = vmatprep.subr.mxu1 %v1484_v53 }
  0x80   :  { %918 = vmatprep.subr.bf16.mxu0 %v1706_v58  ;;  %v1452_v58 = vunpack.c.h.bf16 %v1511_v56  ;;  %v144_v61 = vpack.c.bf16 %v116_v55, %v109_v54 }
  0x82   :  { %823 = vmatmul.mubr.bf16.gmra.mxu0 %v140_v63  ;;  %v1510_v63 = vld [vmem:[#allocation7 + $0x30] sm:$0xff]  }
  0x83   :  { %919 = vmatpush1.bf16.msra.mxu0 %v1704_v0  ;;  %938 = vmatprep.mubr.bf16.mxu0 %v124_v1  ;;  %v1479_v0 = vunpack.c.l.bf16 %v1518_v60  ;;  %v1448_v1 = vunpack.c.h.bf16 %v1510_v63 }
  0x84   :  { %920 = vmatprep.subr.bf16.mxu0 %v1709_v2  ;;  %896 = vmatmul.mubr.bf16.gmra.mxu1 %v142_v3  ;;  %v1447_v2 = vunpack.c.l.bf16 %v1510_v63  ;;  %v1517_v3 = vld [vmem:[#allocation7 + $0x68] sm:$0xff]  }
  0x85   :  { %1011 = vmatprep.mubr.bf16.mxu1 %v1832_v6 }
  0x87   :  { %921 = vmatpush1.bf16.msra.mxu0 %v1707_v4  ;;  %v1476_v4 = vunpack.c.h.bf16 %v1517_v3 }
  0x88   :  { %922 = vmatprep.subr.bf16.mxu0 %v1712_v5  ;;  %v1509_v5 = vld [vmem:[#allocation7 + $0x28] sm:$0xff]  }
  0x89   :  { %v1444_v7 = vunpack.c.h.bf16 %v1509_v5  ;;  %v1443_v8 = vunpack.c.l.bf16 %v1509_v5 }
  0x8b   :  { %923 = vmatpush2.bf16.msra.mxu0 %v1710_v9  ;;  %v1516_v9 = vld [vmem:[#allocation7 + $0x60] sm:$0xff]  }
  0x8c   :  { %924 = vmatprep.subr.bf16.mxu0 %v1718_v10  ;;  %1400 = vmatmul.mubr.msk.bf16.vlgmr.msra.gmra.mxu1 %vm747_vm0, %v125_v11  ;;  %v1472_v10 = vunpack.c.h.bf16 %v1516_v9  ;;  %v1508_v11 = vld [vmem:[#allocation7 + $0x20] sm:$0xff]  }
  0x8d   :  { %1021 = vmatprep.mubr.bf16.mxu1 %v1832_v6  ;;  %1524 = vmatpush3.msra.mxu1 %v1452_v58  ;;  %v1439_v14 = vunpack.c.l.bf16 %v1508_v11 }
  0x8e   :  { %1525 = vmatprep.subr.mxu1 %v1483_v57 }
  0x8f   :  { %925 = vmatpush2.bf16.msra.mxu0 %v1716_v12  ;;  %1526 = vmatpush3.msra.mxu1 %v1451_v59  ;;  %v1471_v12 = vunpack.c.l.bf16 %v1516_v9 }
  0x90   :  { %926 = vmatprep.subr.bf16.mxu0 %v1721_v13  ;;  %1527 = vmatprep.subr.mxu1 %v1480_v62  ;;  %v1440_v13 = vunpack.c.h.bf16 %v1508_v11  ;;  %v245_v11 = vld [vmem:[%s1968_s2] sm:$0x3] }
  0x91   :  { %1528 = vmatpush3.msra.mxu1 %v1448_v1 }
  0x92   :  { %1529 = vmatprep.subr.mxu1 %v1479_v0 }
  0x93   :  { %927 = vmatpush2.bf16.msra.mxu0 %v1719_v16  ;;  %1530 = vmatpush3.msra.mxu1 %v1447_v2  ;;  %v1468_v16 = vunpack.c.h.bf16 %v1515_v15 }
  0x94   :  { %928 = vmatprep.subr.bf16.mxu0 %v1724_v17  ;;  %1401 = vmatmul.mubr.msk.bf16.gmra.mxu1 %vm747_vm0, %v132_v18  ;;  %v1507_v17 = vld [vmem:[#allocation7 + $0x18] sm:$0xff]   ;;  %v1467_v18 = vunpack.c.l.bf16 %v1515_v15 }
  0x95   :  { %1031 = vmatprep.mubr.bf16.mxu1 %v1832_v6  ;;  %1531 = vmatprep.subr.mxu1 %v1476_v4  ;;  %v247_v4 = vlaneseq }
  0x96   :  { %1532 = vmatpush3.msra.mxu1 %v1444_v7 }
  0x97   :  { %929 = vmatpush2.bf16.msra.mxu0 %v1722_v19  ;;  %v1436_v19 = vunpack.c.h.bf16 %v1507_v17  ;;  %v248_v7 = vshrl.u32 %v247_v4, 7 }
  0x98   :  { %930 = vmatprep.subr.bf16.mxu0 %v1727_v20  ;;  %v1435_v20 = vunpack.c.l.bf16 %v1507_v17 }
  0x9b   :  { %931 = vmatpush2.bf16.msra.mxu0 %v1725_v23  ;;  %v1506_v23 = vld [vmem:[#allocation7 + $0x10] sm:$0xff]  }
  0x9c   :  { %932 = vmatprep.subr.bf16.mxu0 %v1730_v24  ;;  %1402 = vmatmul.mubr.msk.bf16.gmra.mxu1 %vm747_vm0, %v139_v25  ;;  %v1432_v24 = vunpack.c.h.bf16 %v1506_v23  ;;  %v1463_v25 = vunpack.c.l.bf16 %v1514_v21 }
  0x9d   :  { %1041 = vmatprep.mubr.bf16.mxu1 %v1832_v6  ;;  %v1475_v6 = vunpack.c.l.bf16 %v1517_v3 }
  0x9f   :  { %933 = vmatpush2.bf16.msra.mxu0 %v1728_v26  ;;  %1533 = vmatprep.subr.mxu1 %v1475_v6  ;;  %v1431_v26 = vunpack.c.l.bf16 %v1506_v23 }
  0xa0   :  { %934 = vmatprep.subr.bf16.mxu0 %v1733_v27  ;;  %1534 = vmatpush3.msra.mxu1 %v1443_v8  ;;  %v1513_v27 = vld [vmem:[#allocation7 + $0x48] sm:$0xff]  }
  0xa1   :  { %1535 = vmatprep.subr.mxu1 %v1472_v10  ;;  %v1460_v28 = vunpack.c.h.bf16 %v1513_v27  ;;  %v249_v10 = vsub.s32 0, %v248_v7 }
  0xa2   :  { %1536 = vmatpush3.msra.mxu1 %v1440_v13  ;;  %v253_v13 = vsub.s32 1, %v248_v7 }
  0xa3   :  { %935 = vmatpush2.bf16.msra.mxu0 %v1731_v30  ;;  %1537 = vmatprep.subr.mxu1 %v1471_v12  ;;  %v1428_v30 = vunpack.c.h.bf16 %v1505_v29  ;;  %v1915_v15 = vrot.slane %v245_v11, %v249_v10 }
  0xa4   :  { %936 = vmatprep.subr.bf16.mxu0 %v1736_v31  ;;  %1403 = vmatmul.mubr.msk.bf16.gmra.mxu1 %vm747_vm0, %v146_v32  ;;  %v1459_v31 = vunpack.c.l.bf16 %v1513_v27  ;;  %v1427_v32 = vunpack.c.l.bf16 %v1505_v29  ;;  %v1917_v17 = vrot.slane %v245_v11, %v253_v13 }
  0xa5   :  { %1538 = vmatpush3.msra.mxu1 %v1439_v14 }
  0xa6   :  { %1539 = vmatprep.subr.mxu1 %v1468_v16 }
  0xa7   :  { %937 = vmatpush2.bf16.msra.mxu0 %v1734_v33  ;;  %1540 = vmatpush3.msra.mxu1 %v1436_v19  ;;  %v1512_v33 = vld [vmem:[#allocation7 + $0x40] sm:$0xff]  }
  0xa8   :  { %1541 = vmatprep.subr.mxu1 %v1467_v18  ;;  %v1456_v34 = vunpack.c.h.bf16 %v1512_v33  ;;  %v1455_v37 = vunpack.c.l.bf16 %v1512_v33 }
  0xa9   :  { %1542 = vmatpush3.msra.mxu1 %v1435_v20 }
  0xaa   :  { %939 = vmatmul.mubr.bf16.vlgmr.msra.gmra.mxu0 %v123_v38  ;;  %1543 = vmatprep.subr.mxu1 %v1464_v22  ;;  %v1423_v38 = vunpack.c.l.bf16 %v1422_v35 }
  0xab   :  { %948 = vmatprep.mubr.bf16.mxu0 %v131_v39  ;;  %1544 = vmatpush3.msra.mxu1 %v1432_v24 }
  0xac   :  { %1545 = vmatprep.subr.mxu1 %v1463_v25 }
  0xad   :  { %1546 = vmatpush3.msra.mxu1 %v1431_v26 }
  0xae   :  { %1547 = vmatprep.subr.mxu1 %v1460_v28 }
  0xaf   :  { %1548 = vmatpush3.msra.mxu1 %v1428_v30 }
  0xb0   :  { %1549 = vmatprep.subr.mxu1 %v1459_v31 }
  0xb1   :  { %1550 = vmatpush3.msra.mxu1 %v1427_v32 }
  0xb2   :  { %949 = vmatmul.mubr.bf16.gmra.mxu0 %v130_v44  ;;  %1551 = vmatprep.subr.mxu1 %v1456_v34 }
  0xb3   :  { %958 = vmatprep.mubr.bf16.mxu0 %v138_v45  ;;  %1552 = vmatpush3.msra.mxu1 %v1424_v36 }
  0xb4   :  { %1553 = vmatprep.subr.mxu1 %v1455_v37 }
  0xb5   :  { %1554 = vmatpush3.msra.mxu1 %v1423_v38 }
  0xba   :  { %959 = vmatmul.mubr.bf16.gmra.mxu0 %v137_v50 }
  0xbb   :  { %968 = vmatprep.mubr.bf16.mxu0 %v145_v51 }
  0xc2   :  { %969 = vmatmul.mubr.bf16.gmra.mxu0 %v144_v61 }
 0x12a   :  { %v794_v40 = vpop.f32.mrf.mxu0 }
 0x12b   :  { %v795_v19 = vadd.f32 %v794_v40, %v1915_v15 }
 0x12c   :  { %v867_v39 = vpop.f32.mrf.mxu1  ;;  %v796_v43 = vpop.f32.mrf.mxu0 }
 0x12d   :  { %v797_v21 = vadd.f32 %v796_v43, %v1917_v17  ;;  %v868_v23 = vadd.f32 %v867_v39, %v795_v19 }
 0x12e   :  { %v869_v41 = vpop.f32.mrf.mxu1  ;;  %v798_v46 = vpop.f32.mrf.mxu0 }
 0x12f   :  { %v799_v24 = vadd.f32 %v798_v46, %v1915_v15  ;;  %v870_v27 = vadd.f32 %v869_v41, %v797_v21 }
 0x130   :  { %v871_v42 = vpop.f32.mrf.mxu1  ;;  %v800_v49 = vpop.f32.mrf.mxu0 }
 0x131   :  { %v801_v28 = vadd.f32 %v800_v49, %v1917_v17  ;;  %v872_v31 = vadd.f32 %v871_v42, %v799_v24 }
 0x132   :  { %v873_v44 = vpop.f32.mrf.mxu1  ;;  %v804_v51 = vpop.f32.mrf.mxu0 }
 0x133   :  { %v805_v32 = vadd.f32 %v804_v51, %v1915_v15  ;;  %v874_v37 = vadd.f32 %v873_v44, %v801_v28 }
 0x134   :  { %v877_v45 = vpop.f32.mrf.mxu1  ;;  %v806_v54 = vpop.f32.mrf.mxu0 }
 0x135   :  { %v807_v38 = vadd.f32 %v806_v54, %v1917_v17  ;;  %v878_v46 = vadd.f32 %v877_v45, %v805_v32 }
 0x136   :  { %v1880_v47 = vpop.f32.mrf.mxu1  ;;  %v808_v57 = vpop.f32.mrf.mxu0 }
 0x137   :  { %v809_v41 = vadd.f32 %v808_v57, %v1915_v15  ;;  %v880_v51 = vadd.f32 %v1880_v47, %v807_v38 }
 0x138   :  { %v1882_v48 = vpop.f32.mrf.mxu1  ;;  %v810_v60 = vpop.f32.mrf.mxu0 }
 0x13a   :  { %v1884_v50 = vpop.f32.mrf.mxu1  ;;  %v814_v63 = vpop.f32.mrf.mxu0 }
 0x13b   :  { %v815_v45 = vadd.f32 %v814_v63, %v1915_v15 }
 0x13c   :  { %v1886_v52 = vpop.f32.mrf.mxu1  ;;  %v1902_v1 = vpop.f32.mrf.mxu0 }
 0x13d   :  { %v817_v47 = vadd.f32 %v1902_v1, %v1917_v17 }
 0x13e   :  { %v1888_v53 = vpop.f32.mrf.mxu1  ;;  %v1904_v3 = vpop.f32.mrf.mxu0 }
 0x13f   :  { %v819_v63 = vadd.f32 %v1904_v3, %v1915_v15 }
 0x140   :  { %v1890_v55 = vpop.f32.mrf.mxu1  ;;  %v1906_v6 = vpop.f32.mrf.mxu0 }
 0x141   :  { %v821_v1 = vadd.f32 %v1906_v6, %v1917_v17 }
 0x142   :  { %v1892_v56 = vpop.f32.mrf.mxu1  ;;  %v1908_v9 = vpop.f32.mrf.mxu0 }
 0x143   :  { %v825_v3 = vadd.f32 %v1908_v9, %v1915_v15 }
 0x144   :  { %v1894_v58 = vpop.f32.mrf.mxu1  ;;  %v1913_v14 = vpop.f32.mrf.mxu0 }
 0x145   :  { %v827_v6 = vadd.f32 %v1913_v14, %v1917_v17 }
 0x146   :  { %v1896_v59 = vpop.f32.mrf.mxu1  ;;  %v1919_v18 = vpop.f32.mrf.mxu0 }
 0x147   :  { %v829_v9 = vadd.f32 %v1919_v18, %v1915_v15 }
 0x148   :  { %v1898_v61 = vpop.f32.mrf.mxu1  ;;  %v1923_v22 = vpop.f32.mrf.mxu0 }
 0x149   :  { %v831_v14 = vadd.f32 %v1923_v22, %v1917_v17 }
 0x14a   :  { %v1900_v62 = vpop.f32.mrf.mxu1 }
 0x14c   :  { %v1013_v0 = vpop.f32.mrf.mxu1 }
 0x14e   :  { %v1015_v2 = vpop.f32.mrf.mxu1 }
 0x150   :  { %v1017_v5 = vpop.f32.mrf.mxu1 }
 0x152   :  { %v1019_v8 = vpop.f32.mrf.mxu1 }
 0x154   :  { %v1023_v12 = vpop.f32.mrf.mxu1 }
 0x156   :  { %v1025_v16 = vpop.f32.mrf.mxu1 }
 0x158   :  { %v1027_v20 = vpop.f32.mrf.mxu1 }
 0x15a   :  { %v1029_v26 = vpop.f32.mrf.mxu1 }
 0x15c   :  { %v1033_v36 = vpop.f32.mrf.mxu1 }
 0x15e   :  { %v1035_v11 = vpop.f32.mrf.mxu1 }
 0x160   :  { %v1037_v24 = vpop.f32.mrf.mxu1 }
 0x162   :  { %v1039_v32 = vpop.f32.mrf.mxu1 }
 0x16a   :  { %v940_v25 = vpop.f32.mrf.mxu0 }
 0x16b   :  { %v941_v29 = vadd.f32 %v940_v25, %v868_v23 }
 0x16c   :  { %v942_v30 = vpop.f32.mrf.mxu0 }
 0x16d   :  { %v943_v33 = vadd.f32 %v942_v30, %v870_v27  ;;  %v1014_v34 = vadd.f32 %v1013_v0, %v941_v29  ;;  %v811_v0 = vadd.f32 %v810_v60, %v1917_v17 }
 0x16e   :  { %v944_v35 = vpop.f32.mrf.mxu0 }
 0x16f   :  { %v1016_v39 = vadd.f32 %v1015_v2, %v943_v33  ;;  %v945_v40 = vadd.f32 %v944_v35, %v872_v31  ;;  %v1052_v7 = vmax.f32 %v1014_v34, 0.0  ;;  %v882_v2 = vadd.f32 %v1882_v48, %v809_v41 }
 0x170   :  { %v946_v43 = vpop.f32.mrf.mxu0  ;;  %v884_v25 = vadd.f32 %v1884_v50, %v811_v0  ;;  %v888_v48 = vadd.f32 %v1886_v52, %v815_v45  ;;  %v890_v50 = vadd.f32 %v1888_v53, %v817_v47  ;;  %v892_v52 = vadd.f32 %v1890_v55, %v819_v63 }
 0x171   :  { %v1053_v4 = vmax.f32 %v1016_v39, 0.0  ;;  %v947_v49 = vadd.f32 %v946_v43, %v874_v37  ;;  %v1018_v10 = vadd.f32 %v1017_v5, %v945_v40  ;;  %v1043_v40 = vpop.f32.mrf.mxu1  ;;  %v894_v53 = vadd.f32 %v1892_v56, %v821_v1 }
 0x172   :  { %v950_v42 = vpop.f32.mrf.mxu0  ;;  %v898_v55 = vadd.f32 %v1894_v58, %v825_v3  ;;  %v900_v56 = vadd.f32 %v1896_v59, %v827_v6  ;;  %v902_v58 = vadd.f32 %v1898_v61, %v829_v9 }
 0x173   :  { %v1020_v13 = vadd.f32 %v1019_v8, %v947_v49  ;;  %v951_v44 = vadd.f32 %v950_v42, %v878_v46  ;;  %1203 = vmatprep.mubr.f32.mxu1 %v1053_v4  ;;  %v1054_v21 = vmax.f32 %v1018_v10, 0.0 }
 0x174   :  { %v952_v54 = vpop.f32.mrf.mxu0  ;;  %1204 = vmatmul.mubr.f32.vlgmr.msra.gmra.mxu1 %v1052_v7  ;;  %v1045_v7 = vpop.f32.mrf.mxu1 }
 0x175   :  { %v1055_v57 = vmax.f32 %v1020_v13, 0.0  ;;  %v953_v19 = vadd.f32 %v952_v54, %v880_v51  ;;  %v1024_v23 = vadd.f32 %v1023_v12, %v951_v44 }
 0x176   :  { %v954_v5 = vpop.f32.mrf.mxu0  ;;  %v1047_v44 = vpop.f32.mrf.mxu1 }
 0x177   :  { %v1026_v60 = vadd.f32 %v1025_v16, %v953_v19  ;;  %v955_v8 = vadd.f32 %v954_v5, %v882_v2  ;;  %1208 = vmatprep.mubr.f32.mxu1 %v1055_v57  ;;  %v1056_v12 = vmax.f32 %v1024_v23, 0.0  ;;  %v904_v2 = vadd.f32 %v1900_v62, %v831_v14 }
 0x178   :  { %v956_v27 = vpop.f32.mrf.mxu0  ;;  %1209 = vmatmul.mubr.f32.gmra.mxu1 %v1054_v21  ;;  %v1049_v21 = vpop.f32.mrf.mxu1 }
 0x179   :  { %v1057_v28 = vmax.f32 %v1026_v60, 0.0  ;;  %v957_v29 = vadd.f32 %v956_v27, %v884_v25  ;;  %v1028_v30 = vadd.f32 %v1027_v20, %v955_v8  ;;  %v1404_v8 = vld [vmem:[%s1970_s4] ss:$0 sm:$0xff]  ;;  %s1833_s4 = smov [#allocation8]  }
 0x17a   :  { %v960_v31 = vpop.f32.mrf.mxu0  ;;  %s1289_s14 = sshll.u32 %s1833_s4, 4  ;;  %s1290_s14 = int_to_ptr.vmem [resolvable:$true] %s1289_s14 }
 0x17b   :  { %v1030_v16 = vadd.f32 %v1029_v26, %v957_v29  ;;  %v961_v33 = vadd.f32 %v960_v31, %v888_v48  ;;  %1213 = vmatprep.mubr.f32.mxu1 %v1057_v28  ;;  %v1058_v20 = vmax.f32 %v1028_v30, 0.0  ;;  %s1797_s15 = scalar_lea.vmem %s1290_s14, 512  ;;  %p1802_p2 = scmp.lt.s32.totalorder %s1290_s14, %s1290_s14 }
 0x17c   :  { %v962_v34 = vpop.f32.mrf.mxu0  ;;  %1214 = vmatmul.mubr.f32.gmra.mxu1 %v1056_v12  ;;  %p1798_p1 = scmp.ne.s32.totalorder %s1290_s14, %s1797_s15  ;;  %p1803_p3 = scmp.lt.s32.totalorder %s1797_s15, %s1797_s15 }
 0x17d   :  { %v1059_v35 = vmax.f32 %v1030_v16, 0.0  ;;  %v963_v37 = vadd.f32 %v962_v34, %v890_v50  ;;  %v1034_v38 = vadd.f32 %v1033_v36, %v961_v33 }
 0x17e   :  { %v964_v39 = vpop.f32.mrf.mxu0  ;;  %p1804_p4 = por %p1803_p3, %p1802_p2 }
 0x17f   :  { %v1036_v26 = vadd.f32 %v1035_v11, %v963_v37  ;;  %v965_v43 = vadd.f32 %v964_v39, %v892_v52  ;;  %1218 = vmatprep.mubr.f32.mxu1 %v1059_v35  ;;  %v1060_v36 = vmax.f32 %v1034_v38, 0.0 }
 0x180   :  { %v966_v46 = vpop.f32.mrf.mxu0  ;;  %1219 = vmatmul.mubr.f32.gmra.mxu1 %v1058_v20  ;;  %p1805_p5 = pnand %p1804_p4, %p1798_p1 }
 0x181   :  { %v1061_v41 = vmax.f32 %v1036_v26, 0.0  ;;  %v967_v4 = vadd.f32 %v966_v46, %v894_v53  ;;  %v1038_v49 = vadd.f32 %v1037_v24, %v965_v43 }
 0x182   :  { %v970_v10 = vpop.f32.mrf.mxu0 }
 0x183   :  { %v1040_v42 = vadd.f32 %v1039_v32, %v967_v4  ;;  %v971_v11 = vadd.f32 %v970_v10, %v898_v55  ;;  %1223 = vmatprep.mubr.f32.mxu1 %v1061_v41  ;;  %v1062_v18 = vmax.f32 %v1038_v49, 0.0 }
 0x184   :  { %v972_v51 = vpop.f32.mrf.mxu0  ;;  %1224 = vmatmul.mubr.f32.gmra.mxu1 %v1060_v36 }
 0x185   :  { %v1063_v0 = vmax.f32 %v1040_v42, 0.0  ;;  %v973_v15 = vadd.f32 %v972_v51, %v900_v56  ;;  %v1044_v13 = vadd.f32 %v1043_v40, %v971_v11 }
 0x186   :  { %v974_v54 = vpop.f32.mrf.mxu0 }
 0x187   :  { %v1046_v45 = vadd.f32 %v1045_v7, %v973_v15  ;;  %v975_v59 = vadd.f32 %v974_v54, %v902_v58  ;;  %1228 = vmatprep.mubr.f32.mxu1 %v1063_v0  ;;  %v1064_v19 = vmax.f32 %v1044_v13, 0.0 }
 0x188   :  { %v976_v57 = vpop.f32.mrf.mxu0  ;;  %1229 = vmatmul.mubr.f32.gmra.mxu1 %v1062_v18 }
 0x189   :  { %v1065_v17 = vmax.f32 %v1046_v45, 0.0  ;;  %v977_v22 = vadd.f32 %v976_v57, %v904_v2  ;;  %v1048_v23 = vadd.f32 %v1047_v44, %v975_v59 }
 0x18b   :  { %v1050_v5 = vadd.f32 %v1049_v21, %v977_v22  ;;  %1233 = vmatprep.mubr.f32.mxu1 %v1065_v17  ;;  %v1066_v24 = vmax.f32 %v1048_v23, 0.0 }
 0x18c   :  { %1234 = vmatmul.mubr.f32.gmra.mxu1 %v1064_v19 }
 0x18d   :  { %v1067_v61 = vmax.f32 %v1050_v5, 0.0 }
 0x18f   :  { %1238 = vmatprep.mubr.f32.mxu1 %v1067_v61 }
 0x190   :  { %1239 = vmatmul.mubr.f32.gmra.mxu1 %v1066_v24 }
 0x234   :  { %v1555_v25 = vpop.f32.mrf.mxu1 }
 0x236   :  { %v1556_v47 = vpop.f32.mrf.mxu1 }
 0x237   :  { %v1557_v60 = vadd.f32 %v1556_v47, %v1555_v25 }
 0x238   :  { %v1558_v62 = vpop.f32.mrf.mxu1 }
 0x239   :  { %v1206_v28 = vadd.f32 %v1557_v60, %v1404_v8 }
 0x23a   :  { %v1559_v27 = vpop.f32.mrf.mxu1 }
 0x23b   :  { %v1560_v48 = vadd.f32 %v1559_v27, %v1558_v62 }
 0x23c   :  { %v1561_v63 = vpop.f32.mrf.mxu1 }
 0x23d   :  { %v1211_v29 = vadd.f32 %v1560_v48, %v1404_v8 }
 0x23e   :  { %v1562_v12 = vpop.f32.mrf.mxu1 }
 0x23f   :  { %v1488_v30 = vpack.c.bf16 %v1211_v29, %v1206_v28  ;;  %v1563_v32 = vadd.f32 %v1562_v12, %v1561_v63 }
 0x240   :  { %v1564_v31 = vpop.f32.mrf.mxu1 }
 0x241   :  { %1489 = vst [vmem:[#allocation8] sm:$0xff] %v1488_v30   ;;  %v1216_v33 = vadd.f32 %v1563_v32, %v1404_v8 }
 0x242   :  { %v1565_v50 = vpop.f32.mrf.mxu1 }
 0x243   :  { %v1566_v1 = vadd.f32 %v1565_v50, %v1564_v31 }
 0x244   :  { %v1567_v16 = vpop.f32.mrf.mxu1 }
 0x245   :  { %v1221_v34 = vadd.f32 %v1566_v1, %v1404_v8 }
 0x246   :  { %v1568_v52 = vpop.f32.mrf.mxu1 }
 0x247   :  { %v1493_v3 = vpack.c.bf16 %v1221_v34, %v1216_v33  ;;  %v1569_v37 = vadd.f32 %v1568_v52, %v1567_v16 }
 0x248   :  { %v1570_v35 = vpop.f32.mrf.mxu1 }
 0x249   :  { %1520 = vst [vmem:[#allocation8 + $0x8] sm:$0xff] %v1493_v3   ;;  %v1226_v40 = vadd.f32 %v1569_v37, %v1404_v8 }
 0x24a   :  { %v1571_v20 = vpop.f32.mrf.mxu1 }
 0x24b   :  { %v1572_v38 = vadd.f32 %v1571_v20, %v1570_v35 }
 0x24c   :  { %v1573_v39 = vpop.f32.mrf.mxu1 }
 0x24d   :  { %v1231_v53 = vadd.f32 %v1572_v38, %v1404_v8 }
 0x24e   :  { %v1574_v6 = vpop.f32.mrf.mxu1 }
 0x24f   :  { %v1498_v26 = vpack.c.bf16 %v1231_v53, %v1226_v40  ;;  %v1575_v46 = vadd.f32 %v1574_v6, %v1573_v39 }
 0x250   :  { %v1576_v43 = vpop.f32.mrf.mxu1 }
 0x251   :  { %1521 = vst [vmem:[#allocation8 + $0x10] sm:$0xff] %v1498_v26   ;;  %v1236_v41 = vadd.f32 %v1575_v46, %v1404_v8 }
 0x252   :  { %v1577_v55 = vpop.f32.mrf.mxu1 }
 0x253   :  { %v1578_v9 = vadd.f32 %v1577_v55, %v1576_v43 }
 0x255   :  { %v1241_v4 = vadd.f32 %v1578_v9, %v1404_v8 }
 0x257   :  { %v1503_v36 = vpack.c.bf16 %v1241_v4, %v1236_v41 }
 0x259   :  { %1522 = vst [vmem:[#allocation8 + $0x18] sm:$0xff] %v1503_v36  }
 0x25a   :  { %1808 = shalt.err (!%p1805_p5)
}
 0x25b   :  { %1295 = dma.vmem_to_hbm [thread:$0]  %s1290_s14, 512, %s1971_s5, [#allocation4], %s1830_s9, %s1830_s9, %s1831_s10  }
 0x25c   :  { %1821 = dma.done.wait [#allocation4], 512  }
 0x25d   :  { %1822 = vsyncadd [#allocation4], 4294966784 }
 0x25e   :  { %1299 = vsyncpa [#allocation3], 1 }
 0x25f   :  { %1300 = vsyncpa [#allocation6], 1 }
 0x260   :  { %1301 = vsyncpa [#allocation4], 1 }

</bundles_post_ra>
